<compile_context>
chip_gen: v7x
topology: tpu7x:2x2x1
jax: 0.10.0
libtpu: 0.0.40
codegen_flags: <defaults>
</compile_context>

<pallas_src>
import functools

import jax
import jax.numpy as jnp
from jax.experimental import pallas as pl
from jax.experimental.pallas import tpu as pltpu

_BN_EPS = 1e-5


# --------------------------------------------------------------------------- #
# Kernel
# --------------------------------------------------------------------------- #
def _aa_fused_kernel(
    x_ref,      # (C_in, TM)        channels on sublanes, pixels on lanes
    wall_ref,   # (3*C_out, C_in)   [W10_h; W10_v; w3_folded]
    bhv_ref,    # (2*C_out, 1)      [bn0[0] shift; bn0[1] shift]
    w2blk_ref,  # (2, 2*C_out)      block-diag [[w2a, 0], [0, w2b]]
    b1_ref,     # (C_out, 1)        bn1 shift
    out_ref,    # (C_out, TM)
):
    x = x_ref[...].astype(jnp.float32)                                      # (C_in, TM)

    # Single weight-stationary channel-mix matmul for conv0∘conv1[0], conv0∘conv1[1]
    # and conv3 (all 1x1 convs == channel matmuls; BN scales pre-folded).
    y = jnp.dot(wall_ref[...], x, preferred_element_type=jnp.float32)       # (3C, TM)

    c2 = bhv_ref.shape[0]          # 2*C_out (static)
    # h/v branches: + bn shift, ReLU.  Rows [0:2C] -> free sublane view.
    hv = jnp.maximum(y[:c2, :] + bhv_ref[...], 0.0)                         # (2C, TM)
    # conv3(x) rows (gate hoisted past conv3: w3 @ (x*attn) == (w3 @ x) * attn).
    y3 = y[c2:, :]                                                          # (C, TM)

    # Both (C_out -> 1) attention projections in one tiny block-diagonal dot.
    logits = jnp.dot(w2blk_ref[...], hv, preferred_element_type=jnp.float32)  # (2, TM)
    attn = jax.nn.sigmoid(logits[0:1, :] * logits[1:2, :])                    # (1, TM)

    # Gate, bn1 shift, ReLU.
    out = jnp.maximum(y3 * attn + b1_ref[...], 0.0)
    out_ref[...] = out.astype(out_ref.dtype)


# --------------------------------------------------------------------------- #
# Wrapper-side parameter folding (one-time, free)
# --------------------------------------------------------------------------- #
def _fold_params(p):
    """Fold inference BN into conv weights, fold conv0 into the branch weights,
    and concatenate everything into one (3*C_out, C_in) channel-mix weight."""
    hi = jax.lax.Precision.HIGHEST

    def bn_scale_shift(bn):
        gamma, beta, mean, var = bn
        scale = gamma / jnp.sqrt(var + _BN_EPS)
        return scale, beta - mean * scale

    s0a, b0a = bn_scale_shift(p["bn0a"])
    s0b, b0b = bn_scale_shift(p["bn0b"])
    s1, b1 = bn_scale_shift(p["bn1"])

    c_out = p["w0"].shape[0]
    # conv0 folded into each (BN-scaled) branch weight: (C_out, C_in).
    w10a = jnp.dot(p["w1a"] * s0a[:, None], p["w0"], precision=hi)
    w10b = jnp.dot(p["w1b"] * s0b[:, None], p["w0"], precision=hi)
    w3f = p["w3"] * s1[:, None]                                   # (C_out, C_in)
    w_all = jnp.concatenate([w10a, w10b, w3f], axis=0)            # (3C_out, C_in)

    b_hv = jnp.concatenate([b0a, b0b], axis=0)[:, None]           # (2C_out, 1)

    z = jnp.zeros((1, c_out), p["w2a"].dtype)
    w2blk = jnp.concatenate(
        [jnp.concatenate([p["w2a"], z], axis=1),
         jnp.concatenate([z, p["w2b"]], axis=1)], axis=0)         # (2, 2C_out)

    return {"w_all": w_all, "b_hv": b_hv, "w2blk": w2blk, "b1": b1[:, None]}


def _vmem_capacity_bytes(default=64 * 1024 * 1024):
    """Generation-aware VMEM capacity (v7x: 64 MiB/TC, v5e/v6e: 128 MiB)."""
    try:
        cap = getattr(pltpu.get_tpu_info(), "vmem_capacity_bytes", None)
        if cap:
            return int(cap)
    except Exception:  # pragma: no cover - conservative fallback
        pass
    return default


# --------------------------------------------------------------------------- #
# Forward
# --------------------------------------------------------------------------- #
def aa_kernel_forward(x_nchw, params, *, tile_cap=65536):
    """x_nchw: (B, C_in, H, W) -> (B, C_out, H, W). Fully fused forward."""
    B, C_in, H, W = x_nchw.shape
    HW = H * W
    kp = _fold_params(params)
    C_out = kp["w_all"].shape[0] // 3

    # Free reshape (no transpose): NCHW is already (B, C, H*W) in memory.
    x3 = x_nchw.reshape(B, C_in, HW)

    # ---- footprint-driven, generation-aware tile size --------------------- #
    vmem_cap = _vmem_capacity_bytes()
    # Rough per-pixel f32 footprint: double-buffered x/out I/O + in-kernel temps
    # (y, hv, attn/logits, out) — conservative upper bound.
    bytes_per_px = 4 * (2 * (C_in + C_out) + 3 * C_out + 2 * C_out + 4)
    budget = max(4 * 1024 * 1024, min(vmem_cap // 3, 48 * 1024 * 1024))
    tm_fit = max(128, (budget // bytes_per_px) // 128 * 128)
    tm_fit = min(tm_fit, tile_cap)

    tm = HW if HW <= tm_fit else tm_fit   # full-dim block is exempt from (8,128) rule

    # ---- guarantee >= 2 grid programs so v7x megacore isn't half idle ----- #
    if B == 1 and HW <= tm and HW >= 256:
        half = (HW // 2) // 128 * 128
        if half >= 128:
            tm = half
    n_tiles = pl.cdiv(HW, tm)             # partial tail tile is masked by Pallas

    def w_spec(arr):
        return pl.BlockSpec(arr.shape, lambda b, i: (0,) * arr.ndim)

    # Scoped VMEM budget: ~75% of physical (48 MiB on v7x, 96 MiB on v5e/v6e),
    # comfortably above the actual double-buffered footprint.
    vmem_limit = int(vmem_cap * 3 // 4)

    out3 = pl.pallas_call(
        _aa_fused_kernel,
        out_shape=jax.ShapeDtypeStruct((B, C_out, HW), x_nchw.dtype),
        grid_spec=pltpu.PrefetchScalarGridSpec(
            num_scalar_prefetch=0,
            grid=(B, n_tiles),
            in_specs=[
                pl.BlockSpec((pl.Squeezed(), C_in, tm), lambda b, i: (b, 0, i)),
                w_spec(kp["w_all"]),
                w_spec(kp["b_hv"]),
                w_spec(kp["w2blk"]),
                w_spec(kp["b1"]),
            ],
            out_specs=pl.BlockSpec((pl.Squeezed(), C_out, tm),
                                   lambda b, i: (b, 0, i)),
        ),
        compiler_params=pltpu.CompilerParams(
            # Every (b, tile) block is independent -> megacore can split the grid.
            dimension_semantics=("parallel", "parallel"),
            vmem_limit_bytes=vmem_limit,
        ),
    )(x3, kp["w_all"], kp["b_hv"], kp["w2blk"], kp["b1"])

    return out3.reshape(B, C_out, H, W)


# --------------------------------------------------------------------------- #
# Synthetic params + pure-JAX reference
# --------------------------------------------------------------------------- #
def init_params(key, c_in, c_out):
    """Synthetic weights with the PyTorch module's shapes (eval-mode BN defaults)."""
    ks = jax.random.split(key, 6)
    f32 = jnp.float32

    def conv_w(k, cout, cin):
        # PyTorch conv weight (cout, cin, 1, 1) squeezed to (cout, cin).
        return 0.2 * jax.random.normal(k, (cout, cin), dtype=f32)

    def bn(cout):
        # (gamma, beta, running_mean, running_var) -- PyTorch defaults.
        return (jnp.ones((cout,), f32), jnp.zeros((cout,), f32),
                jnp.zeros((cout,), f32), jnp.ones((cout,), f32))

    return {
        "w0": conv_w(ks[0], c_out, c_in),
        "w1a": conv_w(ks[1], c_out, c_out),
        "w1b": conv_w(ks[2], c_out, c_out),
        "w2a": conv_w(ks[3], 1, c_out),
        "w2b": conv_w(ks[4], 1, c_out),
        "w3": conv_w(ks[5], c_out, c_in),
        "bn0a": bn(c_out),
        "bn0b": bn(c_out),
        "bn1": bn(c_out),
    }


def reference_forward(x_nchw, p):
    """Pure-JAX (XLA) reference of the PyTorch forward, NCHW throughout."""
    hi = jax.lax.Precision.HIGHEST
    x = x_nchw.astype(jnp.float32)

    def conv1x1(t, w):  # w: (cout, cin)
        return jnp.einsum("oc,bchw->bohw", w, t, precision=hi)

    def bn(t, stats):
        gamma, beta, mean, var = stats
        scale = gamma / jnp.sqrt(var + _BN_EPS)
        shift = beta - mean * scale
        return t * scale[None, :, None, None] + shift[None, :, None, None]

    y0 = conv1x1(x, p["w0"])
    # h branch: permute(0,1,3,2) ... permute back -- identity for 1x1/pointwise ops.
    h = jax.nn.relu(bn(conv1x1(y0, p["w1a"]), p["bn0a"]))
    h_attn = conv1x1(h, p["w2a"])
    v = jax.nn.relu(bn(conv1x1(y0, p["w1b"]), p["bn0b"]))
    v_attn = conv1x1(v, p["w2b"])
    attn = jax.nn.sigmoid(h_attn * v_attn)
    out = jax.nn.relu(bn(conv1x1(x * attn, p["w3"]), p["bn1"]))
    return out.astype(x_nchw.dtype)


if __name__ == "__main__":
    B, C_IN, H, W = 2, 4, 16, 16
    C_OUT = 4  # AA_kernel(in_channel=4, out_channel=4)

    key = jax.random.PRNGKey(0)
    k_x, k_p = jax.random.split(key)
    x = jax.random.normal(k_x, (B, C_IN, H, W), dtype=jnp.float32)
    params = init_params(k_p, C_IN, C_OUT)

    fwd = jax.jit(functools.partial(aa_kernel_forward))
    out = jax.block_until_ready(fwd(x, params))

    ref = reference_forward(x, params)
    assert out.shape == (B, C_OUT, H, W)
    # Tolerance allows for MXU default-precision matmuls (and the exact but
    # re-associated conv0 fold) vs. the HIGHEST-precision XLA reference; real
    # bugs produce O(0.1-1) errors and would still be caught.
    assert jnp.allclose(out, ref, atol=2e-3, rtol=2e-3), "mismatch vs reference"

    print("KERNEL_OK")
</pallas_src>

<mosaic_0001>
module attributes {stable_mosaic.version = 11 : i64} {
  func.func @_aa_fused_kernel(%arg0: i32, %arg1: i32, %arg2: memref<1x4x256xf32, #tpu.memory_space<vmem>>, %arg3: memref<12x4xf32, #tpu.memory_space<vmem>>, %arg4: memref<8x1xf32, #tpu.memory_space<vmem>>, %arg5: memref<2x8xf32, #tpu.memory_space<vmem>>, %arg6: memref<4x1xf32, #tpu.memory_space<vmem>>, %arg7: memref<1x4x256xf32, #tpu.memory_space<vmem>>) attributes {dimension_semantics = [#tpu.dimension_semantics<parallel>, #tpu.dimension_semantics<parallel>], iteration_bounds = array<i64: 2, 1>, scalar_prefetch = 0 : i64, scratch_operands = 0 : i64, tpu.core_type = #tpu.core_type<tc>, window_params = [{transform_indices = @transform_0, window_bounds = array<i64: 1, 4, 256>}, {pipeline_mode = #tpu.pipeline_mode<synchronous>, transform_indices = @transform_1, window_bounds = array<i64: 12, 4>}, {pipeline_mode = #tpu.pipeline_mode<synchronous>, transform_indices = @transform_2, window_bounds = array<i64: 8, 1>}, {pipeline_mode = #tpu.pipeline_mode<synchronous>, transform_indices = @transform_3, window_bounds = array<i64: 2, 8>}, {pipeline_mode = #tpu.pipeline_mode<synchronous>, transform_indices = @transform_4, window_bounds = array<i64: 4, 1>}, {transform_indices = @transform_5, window_bounds = array<i64: 1, 4, 256>}]} {
    %c0 = arith.constant 0 : index
    %c0_0 = arith.constant 0 : index
    %c0_1 = arith.constant 0 : index
    %0 = vector.load %arg2[%c0, %c0_0, %c0_1] : memref<1x4x256xf32, #tpu.memory_space<vmem>>, vector<1x4x256xf32>
    %1 = vector.shape_cast %0 : vector<1x4x256xf32> to vector<4x256xf32>
    %c0_2 = arith.constant 0 : index
    %c0_3 = arith.constant 0 : index
    %2 = vector.load %arg3[%c0_2, %c0_3] : memref<12x4xf32, #tpu.memory_space<vmem>>, vector<12x4xf32>
    %cst = arith.constant dense<0.000000e+00> : vector<12x256xf32>
    %3 = tpu.matmul %2, %1, %cst {dimension_numbers = #tpu.dot_dimension_numbers<[1], [0], [0], [1], [0, 0, 1, 1], [], []>} : vector<12x4xf32>, vector<4x256xf32>, vector<12x256xf32> -> vector<12x256xf32>
    %4 = vector.extract_strided_slice %3 {offsets = [0, 0], sizes = [8, 256], strides = [1, 1]} : vector<12x256xf32> to vector<8x256xf32>
    %c0_4 = arith.constant 0 : index
    %c0_5 = arith.constant 0 : index
    %5 = vector.load %arg4[%c0_4, %c0_5] : memref<8x1xf32, #tpu.memory_space<vmem>>, vector<8x1xf32>
    %6 = vector.broadcast %5 : vector<8x1xf32> to vector<8x256xf32>
    %7 = arith.addf %4, %6 : vector<8x256xf32>
    %cst_6 = arith.constant 0.000000e+00 : f32
    %8 = vector.broadcast %cst_6 : f32 to vector<8x256xf32>
    %9 = arith.maximumf %7, %8 : vector<8x256xf32>
    %10 = vector.extract_strided_slice %3 {offsets = [8, 0], sizes = [4, 256], strides = [1, 1]} : vector<12x256xf32> to vector<4x256xf32>
    %c0_7 = arith.constant 0 : index
    %c0_8 = arith.constant 0 : index
    %11 = vector.load %arg5[%c0_7, %c0_8] : memref<2x8xf32, #tpu.memory_space<vmem>>, vector<2x8xf32>
    %cst_9 = arith.constant dense<0.000000e+00> : vector<2x256xf32>
    %12 = tpu.matmul %11, %9, %cst_9 {dimension_numbers = #tpu.dot_dimension_numbers<[1], [0], [0], [1], [0, 0, 1, 1], [], []>} : vector<2x8xf32>, vector<8x256xf32>, vector<2x256xf32> -> vector<2x256xf32>
    %13 = vector.extract_strided_slice %12 {offsets = [0, 0], sizes = [1, 256], strides = [1, 1]} : vector<2x256xf32> to vector<1x256xf32>
    %14 = vector.extract_strided_slice %12 {offsets = [1, 0], sizes = [1, 256], strides = [1, 1]} : vector<2x256xf32> to vector<1x256xf32>
    %15 = arith.mulf %13, %14 : vector<1x256xf32>
    %16 = arith.negf %15 : vector<1x256xf32>
    %17 = math.exp %16 : vector<1x256xf32>
    %cst_10 = arith.constant 1.000000e+00 : f32
    %18 = vector.broadcast %cst_10 : f32 to vector<1x256xf32>
    %19 = arith.addf %18, %17 : vector<1x256xf32>
    %20 = arith.divf %18, %19 : vector<1x256xf32>
    %21 = vector.broadcast %20 : vector<1x256xf32> to vector<4x256xf32>
    %22 = arith.mulf %10, %21 : vector<4x256xf32>
    %c0_11 = arith.constant 0 : index
    %c0_12 = arith.constant 0 : index
    %23 = vector.load %arg6[%c0_11, %c0_12] : memref<4x1xf32, #tpu.memory_space<vmem>>, vector<4x1xf32>
    %24 = vector.broadcast %23 : vector<4x1xf32> to vector<4x256xf32>
    %25 = arith.addf %22, %24 : vector<4x256xf32>
    %cst_13 = arith.constant 0.000000e+00 : f32
    %26 = vector.broadcast %cst_13 : f32 to vector<4x256xf32>
    %27 = arith.maximumf %25, %26 : vector<4x256xf32>
    %c0_14 = arith.constant 0 : index
    %c0_15 = arith.constant 0 : index
    %c0_16 = arith.constant 0 : index
    %28 = vector.load %arg7[%c0_14, %c0_15, %c0_16] : memref<1x4x256xf32, #tpu.memory_space<vmem>>, vector<1x4x256xf32>
    %29 = vector.shape_cast %28 : vector<1x4x256xf32> to vector<4x256xf32>
    %30 = vector.shape_cast %27 : vector<4x256xf32> to vector<1x4x256xf32>
    tpu.vector_store %arg7[%c0_14, %c0_15, %c0_16], %30 {strides = array<i32>} : memref<1x4x256xf32, #tpu.memory_space<vmem>>, vector<1x4x256xf32>,
    return
  }
  func.func @transform_0(%arg0: i32, %arg1: i32) -> (i32, i32, i32) {
    %c0_i32 = arith.constant 0 : i32
    %c0_i32_0 = arith.constant 0 : i32
    return %arg0, %c0_i32, %arg1 : i32, i32, i32
  }
  func.func @transform_1(%arg0: i32, %arg1: i32) -> (i32, i32) {
    %c0_i32 = arith.constant 0 : i32
    %c0_i32_0 = arith.constant 0 : i32
    %c0_i32_1 = arith.constant 0 : i32
    return %c0_i32, %c0_i32_0 : i32, i32
  }
  func.func @transform_2(%arg0: i32, %arg1: i32) -> (i32, i32) {
    %c0_i32 = arith.constant 0 : i32
    %c0_i32_0 = arith.constant 0 : i32
    %c0_i32_1 = arith.constant 0 : i32
    return %c0_i32, %c0_i32_0 : i32, i32
  }
  func.func @transform_3(%arg0: i32, %arg1: i32) -> (i32, i32) {
    %c0_i32 = arith.constant 0 : i32
    %c0_i32_0 = arith.constant 0 : i32
    %c0_i32_1 = arith.constant 0 : i32
    return %c0_i32, %c0_i32_0 : i32, i32
  }
  func.func @transform_4(%arg0: i32, %arg1: i32) -> (i32, i32) {
    %c0_i32 = arith.constant 0 : i32
    %c0_i32_0 = arith.constant 0 : i32
    %c0_i32_1 = arith.constant 0 : i32
    return %c0_i32, %c0_i32_0 : i32, i32
  }
  func.func @transform_5(%arg0: i32, %arg1: i32) -> (i32, i32, i32) {
    %c0_i32 = arith.constant 0 : i32
    %c0_i32_0 = arith.constant 0 : i32
    return %arg0, %c0_i32, %arg1 : i32, i32, i32
  }
}

</mosaic_0001>

<bundles_post_ra>
// kernel: aa_kernel_forward.1
= control target key start
LH: loop header
LB: loop body
LE: loop exit
PB: predicated region body
PF: predicated region fallthrough
CT: control target
= control target key end

     0   :  { %s688_s18 = smov 0   ;;  %s690_s19 = smov 0   ;;  %s743_s0 = inlined_call_operand.vmem [shape: f32[2,4,256], index: 0, kind: input, shape index: {}]   ;;  %s744_s1 = inlined_call_operand.vmem [shape: f32[12,4], index: 1, kind: input, shape index: {}]   ;;  %s745_s2 = inlined_call_operand.vmem [shape: f32[8,1], index: 2, kind: input, shape index: {}]   ;;  %s746_s3 = inlined_call_operand.vmem [shape: f32[2,8], index: 3, kind: input, shape index: {}]   ;;  %s747_s4 = inlined_call_operand.vmem [shape: f32[4,1], index: 4, kind: input, shape index: {}]   ;;  %s748_s5 = inlined_call_operand.vmem [shape: f32[2,4,256], index: 5, kind: output, shape index: {}]  }
   0x1   :  { %s692_s20 = smov 0  }
   0x2 LB: > { %s27_s21 = sadd.s32 1, %s650_s19  ;;  %p580_p0 = scmp.ge.s32.totalorder %s654_s20, 1  ;;  %s654_s20 = sphi %s692_s20, %s15_s20   ;;  %s650_s19 = sphi %s690_s19, %s750_s19   ;;  %s646_s18 = sphi %s688_s18, %s749_s18  }
   0x3   : > { %p29_p1 = scmp.ge.s32.totalorder %s27_s21, 2  ;;  %p208_p2 = scmp.lt.s32.totalorder %s654_s20, 3 }
   0x5   : > { %s752_s21 = smov (%p29_p1, %s27_s21), 0  ;;  %p209_p3 = pnand %p580_p0, %p208_p2 }
   0x6   : > { %p245_p4 = scmp.lt.s32.totalorder (!%p209_p3), %s646_s18, 1  ;;  %v656_v0 = vmov (!%p209_p3), 0.0   ;;  %v657_v1 = vmov (!%p209_p3), 0   ;;  %v358_v2 = vld [vmem:[%s745_s2] sm:$0xff] (!%p209_p3)  ;;  %vm276_vm0 = vcmask (!%p209_p3), 1043456   ;;  %vm269_vm1 = vcmask (!%p209_p3), 31744  }
   0x7   : > { %212 = sbr.rel (%p209_p3) target bundleno = 495 (0x1ef), region = 40  ;;  %345 = vmatprep.mubr.f32.mxu0 (!%p209_p3), %v656_v0  ;;  %622 = vset.pattern.permute.xlu0 (!%p209_p3), %v657_v1  ;;  %v474_v3 = vld [vmem:[%s747_s4] sm:$0xf] (!%p209_p3)  ;;  %v266_v7 = vld [vmem:[%s744_s1 + $0x8] sm:$0xf] (!%p209_p3)  ;;  %vm369_vm2 = vcmask (!%p209_p3), 64512   ;;  %v464_v30 = vlaneseq (!%p209_p3) }
   0x8   : > { %361 = vperm.xlu0 (!%p209_p3), %622, %v358_v2   ;;  %437 = vmatprep.mubr.f32.mxu1 (!%p209_p3), %v656_v0  ;;  %v265_v6 = vld [vmem:[%s744_s1] sm:$0xff] (!%p209_p3) }
   0x9   : > { %v368_v15 = vld [vmem:[%s746_s3] sm:$0x3] (!%p209_p3)  ;;  %v465_v31 = vshrl.u32 (!%p209_p3), %v464_v30, 7 }
   0xb   : > { %v466_v32 = vsub.s32 (!%p209_p3), 0, %v465_v31 }
   0xc   : > { %477 = vperm.xlu0 (!%p209_p3), %622, %v474_v3  }
   0xe   : > { %s754_s18 = smov (!%p245_p4, %s646_s18), 1 }
   0xf   : > { %s594_s26 = sshll.u32 %s754_s18, 3 }
  0x10   : > { %s252_s29 = scalar_lea.vmem %s743_s0, %s594_s26  ;;  %s262_s13 = scalar_lea.vmem %s748_s5, %s594_s26 }
  0x11   : > { %v264_v4 = vld [vmem:[%s252_s29] sm:$0xff] }
  0x12   : > { %v268_v5 = vcombine.high %v264_v4, %v264_v4 }
  0x14   : > { %585 = vmatprep.subr.msk.mxu0 %vm276_vm0, %v268_v5 }
  0x15   : > { %586 = vmatpush1.msk.msra.mxu0 %vm276_vm0, %v264_v4 }
  0x16   : > { %587 = vmatmul.mubr.msk.f32.vlgmr.msra.gmra.mrb[0].mxu0 %vm269_vm1, %v265_v6 }
  0x17   : > { %351 = vmatprep.mubr.f32.mxu0 %v656_v0 }
  0x1a   : > { %588 = vmatmul.mubr.msk.f32.gmra.mrb[2].mxu0 %vm269_vm1, %v266_v7 }
  0x87   : > { %v362_v8 = vpop.permute.xlu0 %361 }
  0x8b   : > { %v478_v38 = vpop.permute.xlu0 %477 }
  0xe9   : > { %v347_v9 = vpop.f32.mrb[0].mxu0 }
  0xea   : > { %v364_v10 = vadd.f32 %v362_v8, %v347_v9  ;;  %v349_v11 = vpop.f32.mrb[1].mxu0 }
  0xeb   : > { %v365_v12 = vadd.f32 %v362_v8, %v349_v11 }
  0xec   : > { %v366_v14 = vmax.f32 %v364_v10, 0.0 }
  0xed   : > { %v367_v13 = vmax.f32 %v365_v12, 0.0  ;;  %v353_v16 = vpop.f32.mrb[2].mxu0 }
  0xee   : > { %v355_v17 = vpop.f32.mrb[3].mxu0 }
  0xef   : > { %373 = vmatprep.subr.mxu1 %v367_v13 }
  0xf0   : > { %374 = vmatpush1.msra.mxu1 %v366_v14 }
  0xf1   : > { %589 = vmatmul.mubr.msk.f32.vlgmr.msra.gmra.mrb[0].mxu1 %vm369_vm2, %v368_v15 }
 0x1c4   : > { %v439_v18 = vpop.f32.mrb[0].mxu1 }
 0x1c5   : > { %v446_v19 = vrot.slane %v439_v18, 1  ;;  %v441_v20 = vpop.f32.mrb[1].mxu1 }
 0x1c6   : > { %v447_v21 = vrot.slane %v441_v20, 1 }
 0x1c7   : > { %v450_v22 = vmul.f32 %v446_v19, %v439_v18 }
 0x1c8   : > { %v451_v23 = vmul.f32 %v447_v21, %v441_v20 }
 0x1c9   : > { %v590_v24 = vmul.f32 -1.442695, %v450_v22 }
 0x1ca   : > { %v591_v25 = vmul.f32 -1.442695, %v451_v23 }
 0x1cb   : > { %624 = vpow2.f32 %v590_v24 }
 0x1cc   : > { %626 = vpow2.f32 %v591_v25 }
 0x1d5   : > { %v625_v26 = vpop.eup %624 }
 0x1d6   : > { %v627_v27 = vpop.eup %626  ;;  %v458_v28 = vadd.f32 1.0, %v625_v26 }
 0x1d7   : > { %v459_v29 = vadd.f32 1.0, %v627_v27 }
 0x1d8   : > { %628 = vrcp.f32 %v458_v28 }
 0x1d9   : > { %630 = vrcp.f32 %v459_v29 }
 0x1e2   : > { %v629_v33 = vpop.eup %628 }
 0x1e3   : > { %v631_v34 = vpop.eup %630  ;;  %v467_v35 = vrot.slane %v629_v33, %v466_v32 }
 0x1e4   : > { %v471_v36 = vrot.slane %v631_v34, %v466_v32 }
 0x1e5   : > { %v472_v37 = vmul.f32 %v467_v35, %v353_v16 }
 0x1e6   : > { %v473_v39 = vmul.f32 %v471_v36, %v355_v17 }
 0x1e7   : > { %v480_v40 = vadd.f32 %v478_v38, %v472_v37 }
 0x1e8   : > { %v481_v41 = vadd.f32 %v478_v38, %v473_v39 }
 0x1e9   : > { %v482_v42 = vmax.f32 %v480_v40, 0.0 }
 0x1ea   : > { %v483_v43 = vmax.f32 %v481_v41, 0.0 }
 0x1ec   : > { %v486_v44 = vcombine.low %v482_v42, %v483_v43 }
 0x1ee   : > { %488 = vst [vmem:[%s262_s13] sm:$0xff] %v486_v44 }
 0x1ef PF: > { %s15_s20 = sadd.s32 1, %s654_s20   ;;  %s749_s18 = smov %s650_s19 }
 0x1f0   : > { %p12_p5 = scmp.ge.s32.totalorder %s15_s20, 4   ;;  %s750_s19 = smov %s752_s21 }
 0x1f2   :  { %14 = sbr.rel (!%p12_p5) target bundleno = 2 (0x2), region = 70 }

</bundles_post_ra>
